<compile_context>
chip_gen: v6e
topology: v6e:2x2x1
jax: 0.10.0
libtpu: 0.0.40
codegen_flags: <defaults>
</compile_context>

<pallas_src>
import functools
import math

import jax
import jax.numpy as jnp
from jax import lax
from jax.experimental import pallas as pl
from jax.experimental.pallas import tpu as pltpu  # noqa: F401

# ----------------------------------------------------------------------------
# model_config (undefined in the reference source — synthetic small settings)
# ----------------------------------------------------------------------------
model_config = {
    "pca_vector": 16,
    "subcategory_max_num": 3,
    "sentiment_label_dict": {"neg": 0, "neu": 1, "pos": 2},
    "category_label_num": 20,
    "article_type_dict": {"news": 0, "blog": 1, "video": 2, "ad": 3, "misc": 4},
}

EMBED_SETTING = [32, 16, 8, 8]
PCA = model_config["pca_vector"]
SUBMAX = model_config["subcategory_max_num"]
NSENT = len(model_config["sentiment_label_dict"])
NCAT = model_config["category_label_num"]
NTYPE = len(model_config["article_type_dict"])
SLICE_LEN_LIST = [4, PCA, 1, SUBMAX, NSENT, 1, 1, 1]

CAT_W, SENT_W, TYPE_W, TIME_W = EMBED_SETTING
LABEL_DIM = sum(EMBED_SETTING)            # 64
W1_IN = LABEL_DIM + 2                     # 66
OUT_DIM = LABEL_DIM + PCA                 # 80
TARG_OTHER_W = CAT_W + TYPE_W + TIME_W    # 48  (target features minus sentiment)
HIST_OTHER_W = TARG_OTHER_W + 2           # 50  (+ read_time, scroll)


# ----------------------------------------------------------------------------
# The single fused Pallas kernel
# ----------------------------------------------------------------------------
def _fused_forward_kernel(
    # activations (flattened rows, feature dim on lanes)
    sent_h_ref,           # (B*H, NSENT)
    sent_t_ref,           # (B*T, NSENT)
    hist_other_ref,       # (B*H, 50)  [cat(32), type(8), time(8), read(1), scroll(1)]
    targ_other_ref,       # (B*T, 48)  [cat(32), type(8), time(8)]
    ti_h_ref,             # (B*H, PCA)
    ti_t_ref,             # (B*T, PCA)
    # parameters
    sent_w_ref, sent_b_ref,                 # (NSENT,16), (1,16)
    w1_other_ref, w1_sent_ref, w1_b_ref,    # (50,64), (16,64), (1,64)
    lq_other_ref, lq_sent_ref, lq_b_ref,    # (48,64), (16,64), (1,64)
    ti_w_ref, ti_b_ref,                     # (16,16), (1,16)
    # exact f32 lane-placement (selection) matrices for the 80-wide outputs
    p_lbl_ref,            # (64,80): cols [0:64]
    p_ec_sent_ref,        # (16,80): cols [32:48]
    p_ec_oth_ref,         # (48,80): cols [0:32] and [48:64]
    p_tail_ref,           # (16,80): cols [64:80]
    # outputs
    euh_ref,              # (B, T, 80)
    ec_ref,               # (B*T, 80)
    *, batch, hist_len, targ_len):
    f32, bf16 = jnp.float32, jnp.bfloat16

    def mm_bf16(x, w):
        # bf16 MXU inputs, f32 accumulation (full MXU rate on v5e/v6e/v7x).
        return jnp.dot(x.astype(bf16), w.astype(bf16), preferred_element_type=f32)

    def mm_f32(x, w):
        # exact path (used for the identity lane-placement matmuls).
        return jnp.dot(x, w, preferred_element_type=f32)

    # --- sentiment Linear + ReLU (K = NSENT = 3): VPU broadcast FMAs, no MXU.
    sw = sent_w_ref[...]                                    # (3, 16)
    sb = sent_b_ref[...]                                    # (1, 16)

    def sent_embed(s):                                      # s: (rows, 3)
        acc = s[:, 0:1] * sw[0:1, :]
        for i in range(1, sw.shape[0]):
            acc = acc + s[:, i:i + 1] * sw[i:i + 1, :]
        return jnp.maximum(acc + sb, 0.0)                   # (rows, 16)

    sent_h_e = sent_embed(sent_h_ref[...])                  # (B*H, 16)
    sent_t_e = sent_embed(sent_t_ref[...])                  # (B*T, 16)

    # --- w1 on history label features; the feature concat is fused into the
    #     matmul via the row-split weights (no 66-wide activation materialised).
    x_label_h = (mm_bf16(hist_other_ref[...], w1_other_ref[...])
                 + mm_bf16(sent_h_e, w1_sent_ref[...])
                 + w1_b_ref[...])                           # (B*H, 64)

    # --- target query projections (same split-weight fusion of the concat).
    targ_other = targ_other_ref[...]                        # (B*T, 48)
    ti_t = ti_t_ref[...]                                    # (B*T, 16)
    q_label = (mm_bf16(targ_other, lq_other_ref[...])
               + mm_bf16(sent_t_e, lq_sent_ref[...])
               + lq_b_ref[...])                             # (B*T, 64)
    q_ti = mm_bf16(ti_t, ti_w_ref[...]) + ti_b_ref[...]     # (B*T, 16)

    ti_h = ti_h_ref[...]                                    # (B*H, 16)

    # Placement matrices loaded once (reused across the batch loop).
    p_lbl = p_lbl_ref[...]
    p_tail = p_tail_ref[...]

    def attend(q, h, scale):
        # q:(T,D), h:(H,D) -> softmax over history, weighted sum of history.
        # dot_general with contracting dims (1,1): no explicit key transpose.
        sc = lax.dot_general(q.astype(bf16), h.astype(bf16),
                             (((1,), (1,)), ((), ())),
                             preferred_element_type=f32) * scale      # (T, H)
        m = jnp.max(sc, axis=-1, keepdims=True)
        e = jnp.exp(sc - m)                                 # softmax math in f32
        prob = e * pl.reciprocal(jnp.sum(e, axis=-1, keepdims=True), approx=True)
        return mm_bf16(prob, h)                             # (T, D), f32

    lbl_scale = 1.0 / math.sqrt(LABEL_DIM)
    ti_scale = 1.0 / math.sqrt(PCA)

    # Static unroll over the (tiny) batch — still one kernel launch, one body.
    for b in range(batch):
        hs, ts = b * hist_len, b * targ_len
        xl = attend(q_label[ts:ts + targ_len, :],
                    x_label_h[hs:hs + hist_len, :], lbl_scale)        # (T, 64)
        xt = attend(q_ti[ts:ts + targ_len, :],
                    ti_h[hs:hs + hist_len, :], ti_scale)              # (T, 16)
        # Lane placement into the concatenated (T, 80) eu_H slab via exact f32
        # selection matmuls (dense full-width store, no minor-dim concat).
        euh_ref[b] = mm_f32(xl, p_lbl) + mm_f32(xt, p_tail)

    # ec = [all_cat | sent_e | type,time | text_img], assembled the same way.
    ec_ref[...] = (mm_f32(targ_other, p_ec_oth_ref[...])
                   + mm_f32(sent_t_e, p_ec_sent_ref[...])
                   + mm_f32(ti_t, p_tail))


# ----------------------------------------------------------------------------
# Parameters (deterministic synthetic init)
# ----------------------------------------------------------------------------
def init_params(key):
    ks = jax.random.split(key, 18)
    f32 = jnp.float32
    return {
        "category_emb": 0.1 * jax.random.normal(ks[0], (NCAT, EMBED_SETTING[0]), f32),
        "sent_w": 0.1 * jax.random.normal(ks[1], (NSENT, EMBED_SETTING[1]), f32),
        "sent_b": 0.01 * jax.random.normal(ks[2], (EMBED_SETTING[1],), f32),
        "type_emb": 0.1 * jax.random.normal(ks[3], (NTYPE, EMBED_SETTING[2]), f32),
        "w1_w": 0.1 * jax.random.normal(ks[4], (W1_IN, LABEL_DIM), f32),
        "w1_b": 0.01 * jax.random.normal(ks[5], (LABEL_DIM,), f32),
        "year_emb": 0.1 * jax.random.normal(ks[6], (100, EMBED_SETTING[3]), f32),
        "month_emb": 0.1 * jax.random.normal(ks[7], (13, EMBED_SETTING[3]), f32),
        "day_emb": 0.1 * jax.random.normal(ks[8], (32, EMBED_SETTING[3]), f32),
        "hour_emb": 0.1 * jax.random.normal(ks[9], (24, EMBED_SETTING[3]), f32),
        "label_attn_w": 0.1 * jax.random.normal(ks[10], (LABEL_DIM, LABEL_DIM), f32),
        "label_attn_b": 0.01 * jax.random.normal(ks[11], (LABEL_DIM,), f32),
        "ti_attn_w": 0.1 * jax.random.normal(ks[12], (PCA, PCA), f32),
        "ti_attn_b": 0.01 * jax.random.normal(ks[13], (PCA,), f32),
    }


# ----------------------------------------------------------------------------
# Forward pass (JAX gather glue + one fused Pallas kernel)
# ----------------------------------------------------------------------------
def slice_x(x, n):
    out, start = [], 0
    for i in range(n):
        out.append(x[:, :, start: start + SLICE_LEN_LIST[i]])
        start += SLICE_LEN_LIST[i]
    return out


def category_type_features(p, category, sub_category, type_):
    cat_idx = category[..., 0].astype(jnp.int32)                        # (B,L)
    cat_e = jnp.take(p["category_emb"], cat_idx, axis=0)                # (B,L,32)
    sub_e = jnp.take(p["category_emb"], sub_category.astype(jnp.int32),
                     axis=0).mean(axis=2)                               # (B,L,32)
    type_e = jnp.take(p["type_emb"], type_[..., 0].astype(jnp.int32), axis=0)  # (B,L,8)
    return cat_e + sub_e, type_e


def time_embedding(p, time):
    idx = time.astype(jnp.int32)                                        # (B,L,4)
    tables = [p["year_emb"], p["month_emb"], p["day_emb"], p["hour_emb"]]
    out = jnp.zeros(time.shape[:2] + (EMBED_SETTING[3],), jnp.float32)
    for i, tab in enumerate(tables):
        out = out + jnp.take(tab, idx[:, :, i], axis=0)
    return out                                                          # (B,L,8)


def forward(p, x_history, x_target):
    x_history = x_history.astype(jnp.float32)
    x_target = x_target.astype(jnp.float32)

    (x_time_h, x_ti_h, x_cat_h, x_sub_h, x_sent_h, x_type_h,
     x_read_h, x_scroll_h) = slice_x(x_history, 8)
    (x_time_t, x_ti_t, x_cat_t, x_sub_t, x_sent_t, x_type_t) = slice_x(x_target, 6)

    b, hl, tl = x_history.shape[0], x_history.shape[1], x_target.shape[1]

    # ---- gather glue (embedding lookups) stays in plain JAX ----
    cat_h, type_h = category_type_features(p, x_cat_h, x_sub_h, x_type_h)
    cat_t, type_t = category_type_features(p, x_cat_t, x_sub_t, x_type_t)
    time_h = time_embedding(p, x_time_h)
    time_t = time_embedding(p, x_time_t)

    # Non-sentiment feature slabs, flattened to 2D rows for the kernel.
    hist_other = jnp.concatenate(
        [cat_h, type_h, time_h, x_read_h, x_scroll_h], axis=2).reshape(b * hl, HIST_OTHER_W)
    targ_other = jnp.concatenate(
        [cat_t, type_t, time_t], axis=2).reshape(b * tl, TARG_OTHER_W)
    sent_h = x_sent_h.reshape(b * hl, NSENT)
    sent_t = x_sent_t.reshape(b * tl, NSENT)
    ti_h = x_ti_h.reshape(b * hl, PCA)
    ti_t = x_ti_t.reshape(b * tl, PCA)

    # Row-split weights so the [cat|sent|type|time|read|scroll] concats are
    # fused directly into the matmuls inside the kernel.
    w1 = p["w1_w"]
    w1_other = jnp.concatenate([w1[0:CAT_W], w1[CAT_W + SENT_W:W1_IN]], axis=0)      # (50,64)
    w1_sent = w1[CAT_W:CAT_W + SENT_W]                                               # (16,64)
    lq = p["label_attn_w"]
    lq_other = jnp.concatenate([lq[0:CAT_W], lq[CAT_W + SENT_W:LABEL_DIM]], axis=0)  # (48,64)
    lq_sent = lq[CAT_W:CAT_W + SENT_W]                                               # (16,64)

    # Exact f32 lane-placement matrices (constant-folded under jit): `y @ P`
    # drops y's columns at a static lane offset of the 80-wide output slab.
    f32 = jnp.float32
    p_lbl = jnp.zeros((LABEL_DIM, OUT_DIM), f32).at[:, 0:LABEL_DIM].set(
        jnp.eye(LABEL_DIM, dtype=f32))
    p_tail = jnp.zeros((PCA, OUT_DIM), f32).at[:, LABEL_DIM:OUT_DIM].set(
        jnp.eye(PCA, dtype=f32))
    p_ec_sent = jnp.zeros((SENT_W, OUT_DIM), f32).at[:, CAT_W:CAT_W + SENT_W].set(
        jnp.eye(SENT_W, dtype=f32))
    p_ec_oth = jnp.zeros((TARG_OTHER_W, OUT_DIM), f32)
    p_ec_oth = p_ec_oth.at[0:CAT_W, 0:CAT_W].set(jnp.eye(CAT_W, dtype=f32))
    p_ec_oth = p_ec_oth.at[CAT_W:TARG_OTHER_W, CAT_W + SENT_W:LABEL_DIM].set(
        jnp.eye(TYPE_W + TIME_W, dtype=f32))

    # ---- the single fused Pallas kernel (no grid: whole arrays in VMEM) ----
    euh, ec_flat = pl.pallas_call(
        functools.partial(_fused_forward_kernel, batch=b, hist_len=hl, targ_len=tl),
        out_shape=(jax.ShapeDtypeStruct((b, tl, OUT_DIM), jnp.float32),
                   jax.ShapeDtypeStruct((b * tl, OUT_DIM), jnp.float32)),
    )(sent_h, sent_t, hist_other, targ_other, ti_h, ti_t,
      p["sent_w"], p["sent_b"].reshape(1, SENT_W),
      w1_other, w1_sent, p["w1_b"].reshape(1, LABEL_DIM),
      lq_other, lq_sent, p["label_attn_b"].reshape(1, LABEL_DIM),
      p["ti_attn_w"], p["ti_attn_b"].reshape(1, PCA),
      p_lbl, p_ec_sent, p_ec_oth, p_tail)

    return euh, ec_flat.reshape(b, tl, OUT_DIM)


# ----------------------------------------------------------------------------
# Example inputs + run
# ----------------------------------------------------------------------------
def build_inputs(key, batch, length, with_read_scroll):
    ks = jax.random.split(key, 10)
    year = jax.random.randint(ks[0], (batch, length, 1), 0, 100)
    month = jax.random.randint(ks[1], (batch, length, 1), 0, 13)
    day = jax.random.randint(ks[2], (batch, length, 1), 0, 32)
    hour = jax.random.randint(ks[3], (batch, length, 1), 0, 24)
    text_img = jax.random.normal(ks[4], (batch, length, PCA))
    cat = jax.random.randint(ks[5], (batch, length, 1), 0, NCAT)
    sub = jax.random.randint(ks[6], (batch, length, SUBMAX), 0, NCAT)
    sent = jax.random.normal(ks[7], (batch, length, NSENT))
    typ = jax.random.randint(ks[8], (batch, length, 1), 0, NTYPE)
    cols = [year, month, day, hour, text_img, cat, sub, sent, typ]
    if with_read_scroll:
        cols.append(jax.random.uniform(ks[9], (batch, length, 2)))
    return jnp.concatenate([c.astype(jnp.float32) for c in cols], axis=2)


if __name__ == "__main__":
    key = jax.random.PRNGKey(0)
    k_param, k_hist, k_targ = jax.random.split(key, 3)

    B, H_LEN, T_LEN = 2, 8, 4
    params = init_params(k_param)
    x_history = build_inputs(k_hist, B, H_LEN, with_read_scroll=True)   # (2, 8, 30)
    x_target = build_inputs(k_targ, B, T_LEN, with_read_scroll=False)   # (2, 4, 28)

    fwd = jax.jit(forward)
    eu_H, ec = fwd(params, x_history, x_target)
    jax.block_until_ready((eu_H, ec))

    assert eu_H.shape == (B, T_LEN, LABEL_DIM + PCA)
    assert ec.shape == (B, T_LEN, LABEL_DIM + PCA)
    print("KERNEL_OK")
</pallas_src>

<mosaic_0001>
module attributes {stable_mosaic.version = 11 : i64} {
  func.func @_fused_forward_kernel(%arg0: memref<16x3xf32, #tpu.memory_space<vmem>>, %arg1: memref<8x3xf32, #tpu.memory_space<vmem>>, %arg2: memref<16x50xf32, #tpu.memory_space<vmem>>, %arg3: memref<8x48xf32, #tpu.memory_space<vmem>>, %arg4: memref<16x16xf32, #tpu.memory_space<vmem>>, %arg5: memref<8x16xf32, #tpu.memory_space<vmem>>, %arg6: memref<3x16xf32, #tpu.memory_space<vmem>>, %arg7: memref<1x16xf32, #tpu.memory_space<vmem>>, %arg8: memref<50x64xf32, #tpu.memory_space<vmem>>, %arg9: memref<16x64xf32, #tpu.memory_space<vmem>>, %arg10: memref<1x64xf32, #tpu.memory_space<vmem>>, %arg11: memref<48x64xf32, #tpu.memory_space<vmem>>, %arg12: memref<16x64xf32, #tpu.memory_space<vmem>>, %arg13: memref<1x64xf32, #tpu.memory_space<vmem>>, %arg14: memref<16x16xf32, #tpu.memory_space<vmem>>, %arg15: memref<1x16xf32, #tpu.memory_space<vmem>>, %arg16: memref<64x80xf32, #tpu.memory_space<vmem>>, %arg17: memref<16x80xf32, #tpu.memory_space<vmem>>, %arg18: memref<48x80xf32, #tpu.memory_space<vmem>>, %arg19: memref<16x80xf32, #tpu.memory_space<vmem>>, %arg20: memref<2x4x80xf32, #tpu.memory_space<vmem>>, %arg21: memref<8x80xf32, #tpu.memory_space<vmem>>) attributes {dimension_semantics = [], scalar_prefetch = 0 : i64, scratch_operands = 0 : i64, tpu.core_type = #tpu.core_type<tc>} {
    %c0 = arith.constant 0 : index
    %c0_0 = arith.constant 0 : index
    %0 = vector.load %arg6[%c0, %c0_0] : memref<3x16xf32, #tpu.memory_space<vmem>>, vector<3x16xf32>
    %c0_1 = arith.constant 0 : index
    %c0_2 = arith.constant 0 : index
    %1 = vector.load %arg7[%c0_1, %c0_2] : memref<1x16xf32, #tpu.memory_space<vmem>>, vector<1x16xf32>
    %c0_3 = arith.constant 0 : index
    %c0_4 = arith.constant 0 : index
    %2 = vector.load %arg0[%c0_3, %c0_4] : memref<16x3xf32, #tpu.memory_space<vmem>>, vector<16x3xf32>
    %3 = vector.extract_strided_slice %2 {offsets = [0, 0], sizes = [16, 1], strides = [1, 1]} : vector<16x3xf32> to vector<16x1xf32>
    %4 = vector.extract_strided_slice %0 {offsets = [0, 0], sizes = [1, 16], strides = [1, 1]} : vector<3x16xf32> to vector<1x16xf32>
    %5 = vector.broadcast %3 : vector<16x1xf32> to vector<16x16xf32>
    %6 = vector.broadcast %4 : vector<1x16xf32> to vector<16x16xf32>
    %7 = arith.mulf %5, %6 : vector<16x16xf32>
    %8 = vector.extract_strided_slice %2 {offsets = [0, 1], sizes = [16, 1], strides = [1, 1]} : vector<16x3xf32> to vector<16x1xf32>
    %9 = vector.extract_strided_slice %0 {offsets = [1, 0], sizes = [1, 16], strides = [1, 1]} : vector<3x16xf32> to vector<1x16xf32>
    %10 = vector.broadcast %8 : vector<16x1xf32> to vector<16x16xf32>
    %11 = vector.broadcast %9 : vector<1x16xf32> to vector<16x16xf32>
    %12 = arith.mulf %10, %11 : vector<16x16xf32>
    %13 = arith.addf %7, %12 : vector<16x16xf32>
    %14 = vector.extract_strided_slice %2 {offsets = [0, 2], sizes = [16, 1], strides = [1, 1]} : vector<16x3xf32> to vector<16x1xf32>
    %15 = vector.extract_strided_slice %0 {offsets = [2, 0], sizes = [1, 16], strides = [1, 1]} : vector<3x16xf32> to vector<1x16xf32>
    %16 = vector.broadcast %14 : vector<16x1xf32> to vector<16x16xf32>
    %17 = vector.broadcast %15 : vector<1x16xf32> to vector<16x16xf32>
    %18 = arith.mulf %16, %17 : vector<16x16xf32>
    %19 = arith.addf %13, %18 : vector<16x16xf32>
    %20 = vector.broadcast %1 : vector<1x16xf32> to vector<16x16xf32>
    %21 = arith.addf %19, %20 : vector<16x16xf32>
    %cst = arith.constant 0.000000e+00 : f32
    %22 = vector.broadcast %cst : f32 to vector<16x16xf32>
    %23 = arith.maximumf %21, %22 : vector<16x16xf32>
    %c0_5 = arith.constant 0 : index
    %c0_6 = arith.constant 0 : index
    %24 = vector.load %arg1[%c0_5, %c0_6] : memref<8x3xf32, #tpu.memory_space<vmem>>, vector<8x3xf32>
    %25 = vector.extract_strided_slice %24 {offsets = [0, 0], sizes = [8, 1], strides = [1, 1]} : vector<8x3xf32> to vector<8x1xf32>
    %26 = vector.extract_strided_slice %0 {offsets = [0, 0], sizes = [1, 16], strides = [1, 1]} : vector<3x16xf32> to vector<1x16xf32>
    %27 = vector.broadcast %25 : vector<8x1xf32> to vector<8x16xf32>
    %28 = vector.broadcast %26 : vector<1x16xf32> to vector<8x16xf32>
    %29 = arith.mulf %27, %28 : vector<8x16xf32>
    %30 = vector.extract_strided_slice %24 {offsets = [0, 1], sizes = [8, 1], strides = [1, 1]} : vector<8x3xf32> to vector<8x1xf32>
    %31 = vector.extract_strided_slice %0 {offsets = [1, 0], sizes = [1, 16], strides = [1, 1]} : vector<3x16xf32> to vector<1x16xf32>
    %32 = vector.broadcast %30 : vector<8x1xf32> to vector<8x16xf32>
    %33 = vector.broadcast %31 : vector<1x16xf32> to vector<8x16xf32>
    %34 = arith.mulf %32, %33 : vector<8x16xf32>
    %35 = arith.addf %29, %34 : vector<8x16xf32>
    %36 = vector.extract_strided_slice %24 {offsets = [0, 2], sizes = [8, 1], strides = [1, 1]} : vector<8x3xf32> to vector<8x1xf32>
    %37 = vector.extract_strided_slice %0 {offsets = [2, 0], sizes = [1, 16], strides = [1, 1]} : vector<3x16xf32> to vector<1x16xf32>
    %38 = vector.broadcast %36 : vector<8x1xf32> to vector<8x16xf32>
    %39 = vector.broadcast %37 : vector<1x16xf32> to vector<8x16xf32>
    %40 = arith.mulf %38, %39 : vector<8x16xf32>
    %41 = arith.addf %35, %40 : vector<8x16xf32>
    %42 = vector.broadcast %1 : vector<1x16xf32> to vector<8x16xf32>
    %43 = arith.addf %41, %42 : vector<8x16xf32>
    %cst_7 = arith.constant 0.000000e+00 : f32
    %44 = vector.broadcast %cst_7 : f32 to vector<8x16xf32>
    %45 = arith.maximumf %43, %44 : vector<8x16xf32>
    %c0_8 = arith.constant 0 : index
    %c0_9 = arith.constant 0 : index
    %46 = vector.load %arg2[%c0_8, %c0_9] : memref<16x50xf32, #tpu.memory_space<vmem>>, vector<16x50xf32>
    %c0_10 = arith.constant 0 : index
    %c0_11 = arith.constant 0 : index
    %47 = vector.load %arg8[%c0_10, %c0_11] : memref<50x64xf32, #tpu.memory_space<vmem>>, vector<50x64xf32>
    %48 = arith.truncf %46 : vector<16x50xf32> to vector<16x50xbf16>
    %49 = arith.truncf %47 : vector<50x64xf32> to vector<50x64xbf16>
    %cst_12 = arith.constant dense<0.000000e+00> : vector<16x64xf32>
    %50 = tpu.matmul %48, %49, %cst_12 {dimension_numbers = #tpu.dot_dimension_numbers<[1], [0], [0], [1], [0, 0, 1, 1], [], []>} : vector<16x50xbf16>, vector<50x64xbf16>, vector<16x64xf32> -> vector<16x64xf32>
    %c0_13 = arith.constant 0 : index
    %c0_14 = arith.constant 0 : index
    %51 = vector.load %arg9[%c0_13, %c0_14] : memref<16x64xf32, #tpu.memory_space<vmem>>, vector<16x64xf32>
    %52 = arith.truncf %23 : vector<16x16xf32> to vector<16x16xbf16>
    %53 = arith.truncf %51 : vector<16x64xf32> to vector<16x64xbf16>
    %cst_15 = arith.constant dense<0.000000e+00> : vector<16x64xf32>
    %54 = tpu.matmul %52, %53, %cst_15 {dimension_numbers = #tpu.dot_dimension_numbers<[1], [0], [0], [1], [0, 0, 1, 1], [], []>} : vector<16x16xbf16>, vector<16x64xbf16>, vector<16x64xf32> -> vector<16x64xf32>
    %55 = arith.addf %50, %54 : vector<16x64xf32>
    %c0_16 = arith.constant 0 : index
    %c0_17 = arith.constant 0 : index
    %56 = vector.load %arg10[%c0_16, %c0_17] : memref<1x64xf32, #tpu.memory_space<vmem>>, vector<1x64xf32>
    %57 = vector.broadcast %56 : vector<1x64xf32> to vector<16x64xf32>
    %58 = arith.addf %55, %57 : vector<16x64xf32>
    %c0_18 = arith.constant 0 : index
    %c0_19 = arith.constant 0 : index
    %59 = vector.load %arg3[%c0_18, %c0_19] : memref<8x48xf32, #tpu.memory_space<vmem>>, vector<8x48xf32>
    %c0_20 = arith.constant 0 : index
    %c0_21 = arith.constant 0 : index
    %60 = vector.load %arg5[%c0_20, %c0_21] : memref<8x16xf32, #tpu.memory_space<vmem>>, vector<8x16xf32>
    %c0_22 = arith.constant 0 : index
    %c0_23 = arith.constant 0 : index
    %61 = vector.load %arg11[%c0_22, %c0_23] : memref<48x64xf32, #tpu.memory_space<vmem>>, vector<48x64xf32>
    %62 = arith.truncf %59 : vector<8x48xf32> to vector<8x48xbf16>
    %63 = arith.truncf %61 : vector<48x64xf32> to vector<48x64xbf16>
    %cst_24 = arith.constant dense<0.000000e+00> : vector<8x64xf32>
    %64 = tpu.matmul %62, %63, %cst_24 {dimension_numbers = #tpu.dot_dimension_numbers<[1], [0], [0], [1], [0, 0, 1, 1], [], []>} : vector<8x48xbf16>, vector<48x64xbf16>, vector<8x64xf32> -> vector<8x64xf32>
    %c0_25 = arith.constant 0 : index
    %c0_26 = arith.constant 0 : index
    %65 = vector.load %arg12[%c0_25, %c0_26] : memref<16x64xf32, #tpu.memory_space<vmem>>, vector<16x64xf32>
    %66 = arith.truncf %45 : vector<8x16xf32> to vector<8x16xbf16>
    %67 = arith.truncf %65 : vector<16x64xf32> to vector<16x64xbf16>
    %cst_27 = arith.constant dense<0.000000e+00> : vector<8x64xf32>
    %68 = tpu.matmul %66, %67, %cst_27 {dimension_numbers = #tpu.dot_dimension_numbers<[1], [0], [0], [1], [0, 0, 1, 1], [], []>} : vector<8x16xbf16>, vector<16x64xbf16>, vector<8x64xf32> -> vector<8x64xf32>
    %69 = arith.addf %64, %68 : vector<8x64xf32>
    %c0_28 = arith.constant 0 : index
    %c0_29 = arith.constant 0 : index
    %70 = vector.load %arg13[%c0_28, %c0_29] : memref<1x64xf32, #tpu.memory_space<vmem>>, vector<1x64xf32>
    %71 = vector.broadcast %70 : vector<1x64xf32> to vector<8x64xf32>
    %72 = arith.addf %69, %71 : vector<8x64xf32>
    %c0_30 = arith.constant 0 : index
    %c0_31 = arith.constant 0 : index
    %73 = vector.load %arg14[%c0_30, %c0_31] : memref<16x16xf32, #tpu.memory_space<vmem>>, vector<16x16xf32>
    %74 = arith.truncf %60 : vector<8x16xf32> to vector<8x16xbf16>
    %75 = arith.truncf %73 : vector<16x16xf32> to vector<16x16xbf16>
    %cst_32 = arith.constant dense<0.000000e+00> : vector<8x16xf32>
    %76 = tpu.matmul %74, %75, %cst_32 {dimension_numbers = #tpu.dot_dimension_numbers<[1], [0], [0], [1], [0, 0, 1, 1], [], []>} : vector<8x16xbf16>, vector<16x16xbf16>, vector<8x16xf32> -> vector<8x16xf32>
    %c0_33 = arith.constant 0 : index
    %c0_34 = arith.constant 0 : index
    %77 = vector.load %arg15[%c0_33, %c0_34] : memref<1x16xf32, #tpu.memory_space<vmem>>, vector<1x16xf32>
    %78 = vector.broadcast %77 : vector<1x16xf32> to vector<8x16xf32>
    %79 = arith.addf %76, %78 : vector<8x16xf32>
    %c0_35 = arith.constant 0 : index
    %c0_36 = arith.constant 0 : index
    %80 = vector.load %arg4[%c0_35, %c0_36] : memref<16x16xf32, #tpu.memory_space<vmem>>, vector<16x16xf32>
    %c0_37 = arith.constant 0 : index
    %c0_38 = arith.constant 0 : index
    %81 = vector.load %arg16[%c0_37, %c0_38] : memref<64x80xf32, #tpu.memory_space<vmem>>, vector<64x80xf32>
    %c0_39 = arith.constant 0 : index
    %c0_40 = arith.constant 0 : index
    %82 = vector.load %arg19[%c0_39, %c0_40] : memref<16x80xf32, #tpu.memory_space<vmem>>, vector<16x80xf32>
    %83 = vector.extract_strided_slice %72 {offsets = [0, 0], sizes = [4, 64], strides = [1, 1]} : vector<8x64xf32> to vector<4x64xf32>
    %84 = vector.extract_strided_slice %58 {offsets = [0, 0], sizes = [8, 64], strides = [1, 1]} : vector<16x64xf32> to vector<8x64xf32>
    %85 = arith.truncf %83 : vector<4x64xf32> to vector<4x64xbf16>
    %86 = arith.truncf %84 : vector<8x64xf32> to vector<8x64xbf16>
    %cst_41 = arith.constant dense<0.000000e+00> : vector<4x8xf32>
    %87 = tpu.matmul %85, %86, %cst_41 {dimension_numbers = #tpu.dot_dimension_numbers<[1], [1], [0], [0], [0, 0, 1, 0], [], []>} : vector<4x64xbf16>, vector<8x64xbf16>, vector<4x8xf32> -> vector<4x8xf32>
    %cst_42 = arith.constant 1.250000e-01 : f32
    %88 = vector.broadcast %cst_42 : f32 to vector<4x8xf32>
    %89 = arith.mulf %87, %88 : vector<4x8xf32>
    %cst_43 = arith.constant dense<0xFF800000> : vector<4xf32>
    %90 = vector.multi_reduction <maximumf>, %89, %cst_43 [1] : vector<4x8xf32> to vector<4xf32>
    %91 = vector.shape_cast %90 : vector<4xf32> to vector<4x1xf32>
    %92 = vector.broadcast %91 : vector<4x1xf32> to vector<4x8xf32>
    %93 = arith.subf %89, %92 : vector<4x8xf32>
    %94 = math.exp %93 : vector<4x8xf32>
    %cst_44 = arith.constant dense<0.000000e+00> : vector<4xf32>
    %95 = vector.multi_reduction <add>, %94, %cst_44 [1] : vector<4x8xf32> to vector<4xf32>
    %96 = vector.shape_cast %95 : vector<4xf32> to vector<4x1xf32>
    %97 = tpu.reciprocal %96 {approx = true} : vector<4x1xf32> -> vector<4x1xf32>
    %98 = vector.broadcast %97 : vector<4x1xf32> to vector<4x8xf32>
    %99 = arith.mulf %94, %98 : vector<4x8xf32>
    %100 = arith.truncf %99 : vector<4x8xf32> to vector<4x8xbf16>
    %101 = arith.truncf %84 : vector<8x64xf32> to vector<8x64xbf16>
    %cst_45 = arith.constant dense<0.000000e+00> : vector<4x64xf32>
    %102 = tpu.matmul %100, %101, %cst_45 {dimension_numbers = #tpu.dot_dimension_numbers<[1], [0], [0], [1], [0, 0, 1, 1], [], []>} : vector<4x8xbf16>, vector<8x64xbf16>, vector<4x64xf32> -> vector<4x64xf32>
    %103 = vector.extract_strided_slice %79 {offsets = [0, 0], sizes = [4, 16], strides = [1, 1]} : vector<8x16xf32> to vector<4x16xf32>
    %104 = vector.extract_strided_slice %80 {offsets = [0, 0], sizes = [8, 16], strides = [1, 1]} : vector<16x16xf32> to vector<8x16xf32>
    %105 = arith.truncf %103 : vector<4x16xf32> to vector<4x16xbf16>
    %106 = arith.truncf %104 : vector<8x16xf32> to vector<8x16xbf16>
    %cst_46 = arith.constant dense<0.000000e+00> : vector<4x8xf32>
    %107 = tpu.matmul %105, %106, %cst_46 {dimension_numbers = #tpu.dot_dimension_numbers<[1], [1], [0], [0], [0, 0, 1, 0], [], []>} : vector<4x16xbf16>, vector<8x16xbf16>, vector<4x8xf32> -> vector<4x8xf32>
    %cst_47 = arith.constant 2.500000e-01 : f32
    %108 = vector.broadcast %cst_47 : f32 to vector<4x8xf32>
    %109 = arith.mulf %107, %108 : vector<4x8xf32>
    %cst_48 = arith.constant dense<0xFF800000> : vector<4xf32>
    %110 = vector.multi_reduction <maximumf>, %109, %cst_48 [1] : vector<4x8xf32> to vector<4xf32>
    %111 = vector.shape_cast %110 : vector<4xf32> to vector<4x1xf32>
    %112 = vector.broadcast %111 : vector<4x1xf32> to vector<4x8xf32>
    %113 = arith.subf %109, %112 : vector<4x8xf32>
    %114 = math.exp %113 : vector<4x8xf32>
    %cst_49 = arith.constant dense<0.000000e+00> : vector<4xf32>
    %115 = vector.multi_reduction <add>, %114, %cst_49 [1] : vector<4x8xf32> to vector<4xf32>
    %116 = vector.shape_cast %115 : vector<4xf32> to vector<4x1xf32>
    %117 = tpu.reciprocal %116 {approx = true} : vector<4x1xf32> -> vector<4x1xf32>
    %118 = vector.broadcast %117 : vector<4x1xf32> to vector<4x8xf32>
    %119 = arith.mulf %114, %118 : vector<4x8xf32>
    %120 = arith.truncf %119 : vector<4x8xf32> to vector<4x8xbf16>
    %121 = arith.truncf %104 : vector<8x16xf32> to vector<8x16xbf16>
    %cst_50 = arith.constant dense<0.000000e+00> : vector<4x16xf32>
    %122 = tpu.matmul %120, %121, %cst_50 {dimension_numbers = #tpu.dot_dimension_numbers<[1], [0], [0], [1], [0, 0, 1, 1], [], []>} : vector<4x8xbf16>, vector<8x16xbf16>, vector<4x16xf32> -> vector<4x16xf32>
    %cst_51 = arith.constant dense<0.000000e+00> : vector<4x80xf32>
    %123 = tpu.matmul %102, %81, %cst_51 {dimension_numbers = #tpu.dot_dimension_numbers<[1], [0], [0], [1], [0, 0, 1, 1], [], []>} : vector<4x64xf32>, vector<64x80xf32>, vector<4x80xf32> -> vector<4x80xf32>
    %cst_52 = arith.constant dense<0.000000e+00> : vector<4x80xf32>
    %124 = tpu.matmul %122, %82, %cst_52 {dimension_numbers = #tpu.dot_dimension_numbers<[1], [0], [0], [1], [0, 0, 1, 1], [], []>} : vector<4x16xf32>, vector<16x80xf32>, vector<4x80xf32> -> vector<4x80xf32>
    %125 = arith.addf %123, %124 : vector<4x80xf32>
    %c0_53 = arith.constant 0 : index
    %c0_54 = arith.constant 0 : index
    %c0_55 = arith.constant 0 : index
    %126 = vector.load %arg20[%c0_53, %c0_54, %c0_55] : memref<2x4x80xf32, #tpu.memory_space<vmem>>, vector<1x4x80xf32>
    %127 = vector.shape_cast %126 : vector<1x4x80xf32> to vector<4x80xf32>
    %128 = vector.shape_cast %125 : vector<4x80xf32> to vector<1x4x80xf32>
    tpu.vector_store %arg20[%c0_53, %c0_54, %c0_55], %128 {strides = array<i32>} : memref<2x4x80xf32, #tpu.memory_space<vmem>>, vector<1x4x80xf32>,
    %129 = vector.extract_strided_slice %72 {offsets = [4, 0], sizes = [4, 64], strides = [1, 1]} : vector<8x64xf32> to vector<4x64xf32>
    %130 = vector.extract_strided_slice %58 {offsets = [8, 0], sizes = [8, 64], strides = [1, 1]} : vector<16x64xf32> to vector<8x64xf32>
    %131 = arith.truncf %129 : vector<4x64xf32> to vector<4x64xbf16>
    %132 = arith.truncf %130 : vector<8x64xf32> to vector<8x64xbf16>
    %cst_56 = arith.constant dense<0.000000e+00> : vector<4x8xf32>
    %133 = tpu.matmul %131, %132, %cst_56 {dimension_numbers = #tpu.dot_dimension_numbers<[1], [1], [0], [0], [0, 0, 1, 0], [], []>} : vector<4x64xbf16>, vector<8x64xbf16>, vector<4x8xf32> -> vector<4x8xf32>
    %cst_57 = arith.constant 1.250000e-01 : f32
    %134 = vector.broadcast %cst_57 : f32 to vector<4x8xf32>
    %135 = arith.mulf %133, %134 : vector<4x8xf32>
    %cst_58 = arith.constant dense<0xFF800000> : vector<4xf32>
    %136 = vector.multi_reduction <maximumf>, %135, %cst_58 [1] : vector<4x8xf32> to vector<4xf32>
    %137 = vector.shape_cast %136 : vector<4xf32> to vector<4x1xf32>
    %138 = vector.broadcast %137 : vector<4x1xf32> to vector<4x8xf32>
    %139 = arith.subf %135, %138 : vector<4x8xf32>
    %140 = math.exp %139 : vector<4x8xf32>
    %cst_59 = arith.constant dense<0.000000e+00> : vector<4xf32>
    %141 = vector.multi_reduction <add>, %140, %cst_59 [1] : vector<4x8xf32> to vector<4xf32>
    %142 = vector.shape_cast %141 : vector<4xf32> to vector<4x1xf32>
    %143 = tpu.reciprocal %142 {approx = true} : vector<4x1xf32> -> vector<4x1xf32>
    %144 = vector.broadcast %143 : vector<4x1xf32> to vector<4x8xf32>
    %145 = arith.mulf %140, %144 : vector<4x8xf32>
    %146 = arith.truncf %145 : vector<4x8xf32> to vector<4x8xbf16>
    %147 = arith.truncf %130 : vector<8x64xf32> to vector<8x64xbf16>
    %cst_60 = arith.constant dense<0.000000e+00> : vector<4x64xf32>
    %148 = tpu.matmul %146, %147, %cst_60 {dimension_numbers = #tpu.dot_dimension_numbers<[1], [0], [0], [1], [0, 0, 1, 1], [], []>} : vector<4x8xbf16>, vector<8x64xbf16>, vector<4x64xf32> -> vector<4x64xf32>
    %149 = vector.extract_strided_slice %79 {offsets = [4, 0], sizes = [4, 16], strides = [1, 1]} : vector<8x16xf32> to vector<4x16xf32>
    %150 = vector.extract_strided_slice %80 {offsets = [8, 0], sizes = [8, 16], strides = [1, 1]} : vector<16x16xf32> to vector<8x16xf32>
    %151 = arith.truncf %149 : vector<4x16xf32> to vector<4x16xbf16>
    %152 = arith.truncf %150 : vector<8x16xf32> to vector<8x16xbf16>
    %cst_61 = arith.constant dense<0.000000e+00> : vector<4x8xf32>
    %153 = tpu.matmul %151, %152, %cst_61 {dimension_numbers = #tpu.dot_dimension_numbers<[1], [1], [0], [0], [0, 0, 1, 0], [], []>} : vector<4x16xbf16>, vector<8x16xbf16>, vector<4x8xf32> -> vector<4x8xf32>
    %cst_62 = arith.constant 2.500000e-01 : f32
    %154 = vector.broadcast %cst_62 : f32 to vector<4x8xf32>
    %155 = arith.mulf %153, %154 : vector<4x8xf32>
    %cst_63 = arith.constant dense<0xFF800000> : vector<4xf32>
    %156 = vector.multi_reduction <maximumf>, %155, %cst_63 [1] : vector<4x8xf32> to vector<4xf32>
    %157 = vector.shape_cast %156 : vector<4xf32> to vector<4x1xf32>
    %158 = vector.broadcast %157 : vector<4x1xf32> to vector<4x8xf32>
    %159 = arith.subf %155, %158 : vector<4x8xf32>
    %160 = math.exp %159 : vector<4x8xf32>
    %cst_64 = arith.constant dense<0.000000e+00> : vector<4xf32>
    %161 = vector.multi_reduction <add>, %160, %cst_64 [1] : vector<4x8xf32> to vector<4xf32>
    %162 = vector.shape_cast %161 : vector<4xf32> to vector<4x1xf32>
    %163 = tpu.reciprocal %162 {approx = true} : vector<4x1xf32> -> vector<4x1xf32>
    %164 = vector.broadcast %163 : vector<4x1xf32> to vector<4x8xf32>
    %165 = arith.mulf %160, %164 : vector<4x8xf32>
    %166 = arith.truncf %165 : vector<4x8xf32> to vector<4x8xbf16>
    %167 = arith.truncf %150 : vector<8x16xf32> to vector<8x16xbf16>
    %cst_65 = arith.constant dense<0.000000e+00> : vector<4x16xf32>
    %168 = tpu.matmul %166, %167, %cst_65 {dimension_numbers = #tpu.dot_dimension_numbers<[1], [0], [0], [1], [0, 0, 1, 1], [], []>} : vector<4x8xbf16>, vector<8x16xbf16>, vector<4x16xf32> -> vector<4x16xf32>
    %cst_66 = arith.constant dense<0.000000e+00> : vector<4x80xf32>
    %169 = tpu.matmul %148, %81, %cst_66 {dimension_numbers = #tpu.dot_dimension_numbers<[1], [0], [0], [1], [0, 0, 1, 1], [], []>} : vector<4x64xf32>, vector<64x80xf32>, vector<4x80xf32> -> vector<4x80xf32>
    %cst_67 = arith.constant dense<0.000000e+00> : vector<4x80xf32>
    %170 = tpu.matmul %168, %82, %cst_67 {dimension_numbers = #tpu.dot_dimension_numbers<[1], [0], [0], [1], [0, 0, 1, 1], [], []>} : vector<4x16xf32>, vector<16x80xf32>, vector<4x80xf32> -> vector<4x80xf32>
    %171 = arith.addf %169, %170 : vector<4x80xf32>
    %c1 = arith.constant 1 : index
    %c0_68 = arith.constant 0 : index
    %c0_69 = arith.constant 0 : index
    %172 = vector.load %arg20[%c1, %c0_68, %c0_69] : memref<2x4x80xf32, #tpu.memory_space<vmem>>, vector<1x4x80xf32>
    %173 = vector.shape_cast %172 : vector<1x4x80xf32> to vector<4x80xf32>
    %174 = vector.shape_cast %171 : vector<4x80xf32> to vector<1x4x80xf32>
    tpu.vector_store %arg20[%c1, %c0_68, %c0_69], %174 {strides = array<i32>} : memref<2x4x80xf32, #tpu.memory_space<vmem>>, vector<1x4x80xf32>,
    %c0_70 = arith.constant 0 : index
    %c0_71 = arith.constant 0 : index
    %175 = vector.load %arg18[%c0_70, %c0_71] : memref<48x80xf32, #tpu.memory_space<vmem>>, vector<48x80xf32>
    %cst_72 = arith.constant dense<0.000000e+00> : vector<8x80xf32>
    %176 = tpu.matmul %59, %175, %cst_72 {dimension_numbers = #tpu.dot_dimension_numbers<[1], [0], [0], [1], [0, 0, 1, 1], [], []>} : vector<8x48xf32>, vector<48x80xf32>, vector<8x80xf32> -> vector<8x80xf32>
    %c0_73 = arith.constant 0 : index
    %c0_74 = arith.constant 0 : index
    %177 = vector.load %arg17[%c0_73, %c0_74] : memref<16x80xf32, #tpu.memory_space<vmem>>, vector<16x80xf32>
    %cst_75 = arith.constant dense<0.000000e+00> : vector<8x80xf32>
    %178 = tpu.matmul %45, %177, %cst_75 {dimension_numbers = #tpu.dot_dimension_numbers<[1], [0], [0], [1], [0, 0, 1, 1], [], []>} : vector<8x16xf32>, vector<16x80xf32>, vector<8x80xf32> -> vector<8x80xf32>
    %179 = arith.addf %176, %178 : vector<8x80xf32>
    %cst_76 = arith.constant dense<0.000000e+00> : vector<8x80xf32>
    %180 = tpu.matmul %60, %82, %cst_76 {dimension_numbers = #tpu.dot_dimension_numbers<[1], [0], [0], [1], [0, 0, 1, 1], [], []>} : vector<8x16xf32>, vector<16x80xf32>, vector<8x80xf32> -> vector<8x80xf32>
    %181 = arith.addf %179, %180 : vector<8x80xf32>
    %c0_77 = arith.constant 0 : index
    %c0_78 = arith.constant 0 : index
    %182 = vector.load %arg21[%c0_77, %c0_78] : memref<8x80xf32, #tpu.memory_space<vmem>>, vector<8x80xf32>
    tpu.vector_store %arg21[%c0_77, %c0_78], %181 {strides = array<i32>} : memref<8x80xf32, #tpu.memory_space<vmem>>, vector<8x80xf32>,
    return
  }
}

</mosaic_0001>

<bundles_post_ra>
// kernel: forward.1
= control target key start
LH: loop header
LB: loop body
LE: loop exit
PB: predicated region body
PF: predicated region fallthrough
CT: control target
= control target key end

     0   :  { %s2247_s0 = inlined_call_operand.vmem [shape: f32[16,3], index: 0, kind: input, shape index: {}]   ;;  %s2248_s1 = inlined_call_operand.vmem [shape: f32[8,3], index: 1, kind: input, shape index: {}]   ;;  %s2249_s2 = inlined_call_operand.vmem [shape: f32[16,50], index: 2, kind: input, shape index: {}]   ;;  %s2250_s3 = inlined_call_operand.vmem [shape: f32[8,48], index: 3, kind: input, shape index: {}]   ;;  %s2251_s4 = inlined_call_operand.vmem [shape: f32[16,16], index: 4, kind: input, shape index: {}]   ;;  %s2252_s5 = inlined_call_operand.vmem [shape: f32[8,16], index: 5, kind: input, shape index: {}]   ;;  %s2253_s6 = inlined_call_operand.vmem [shape: f32[3,16], index: 6, kind: input, shape index: {}]   ;;  %s2254_s7 = inlined_call_operand.vmem [shape: f32[1,16], index: 7, kind: input, shape index: {}]   ;;  %s2255_s8 = inlined_call_operand.vmem [shape: f32[50,64], index: 8, kind: input, shape index: {}]   ;;  %s2256_s9 = inlined_call_operand.vmem [shape: f32[16,64], index: 9, kind: input, shape index: {}]   ;;  %s2257_s10 = inlined_call_operand.vmem [shape: f32[1,64], index: 10, kind: input, shape index: {}]   ;;  %s2258_s11 = inlined_call_operand.vmem [shape: f32[48,64], index: 11, kind: input, shape index: {}]   ;;  %s2259_s12 = inlined_call_operand.vmem [shape: f32[16,64], index: 12, kind: input, shape index: {}]   ;;  %s2260_s13 = inlined_call_operand.vmem [shape: f32[1,64], index: 13, kind: input, shape index: {}]   ;;  %s2261_s14 = inlined_call_operand.vmem [shape: f32[16,16], index: 14, kind: input, shape index: {}]   ;;  %s2262_s15 = inlined_call_operand.vmem [shape: f32[1,16], index: 15, kind: input, shape index: {}]   ;;  %s2263_s16 = inlined_call_operand.vmem [shape: f32[64,80], index: 16, kind: input, shape index: {}]   ;;  %s2264_s17 = inlined_call_operand.vmem [shape: f32[16,80], index: 17, kind: input, shape index: {}]   ;;  %s2265_s18 = inlined_call_operand.vmem [shape: f32[48,80], index: 18, kind: input, shape index: {}]   ;;  %s2266_s19 = inlined_call_operand.vmem [shape: f32[16,80], index: 19, kind: input, shape index: {}]   ;;  %s2267_s20 = inlined_call_operand.hbm [shape: f32[2,4,80], index: 20, kind: output, shape index: {0}]   ;;  %s2268_s21 = inlined_call_operand.hbm [shape: f32[8,80], index: 21, kind: output, shape index: {1}]  }
   0x1   :  { %2272 = sst [smem:[#allocation8_spill]] %s2247_s0 }
   0x2   :  { %2273 = sst [smem:[#allocation9_spill]] %s2248_s1 }
   0x3   :  { %2274 = sst [smem:[#allocation10_spill]] %s2249_s2 }
   0x4   :  { %2275 = sst [smem:[#allocation11_spill]] %s2250_s3 }
   0x5   :  { %2276 = sst [smem:[#allocation12_spill]] %s2251_s4 }
   0x6   :  { %2277 = sst [smem:[#allocation13_spill]] %s2252_s5 }
   0x7   :  { %27 = vsyncpa [#allocation3], 0  ;;  %s2278_s26 = sld [smem:[#allocation8_spill]]  ;;  %v1775_v1 = vmov 1   ;;  %v1776_v2 = vmov 0   ;;  %vm220_vm0 = vcmask 1040384  }
   0x8   :  { %1708 = vset.pattern.permute.xlu1 %v1775_v1  ;;  %1707 = vset.pattern.permute.xlu0 %v1776_v2  ;;  %v161_v3 = vld [vmem:[%s2255_s8 + $0x30] sm:$0x3] }
   0x9   :  { %v166_v4 = vpack.c.bf16 %v161_v3, %v161_v3 }
   0xd   :  { %v72_v0 = vld [vmem:[%s2278_s26] sm:$0xff] }
   0xe   :  { %91 = vperm.xlu1 %1708, %v72_v0   ;;  %76 = vperm.xlu0 %1707, %v72_v0  }
   0xf   :  { %28 = vsyncpa [#allocation5], 0  ;;  %v73_v5 = vld [vmem:[%s2278_s26 + $0x8] sm:$0xff]  ;;  %v1777_v6 = vmov 0.0   ;;  %v159_v7 = vld [vmem:[%s2255_s8 + $0x20] sm:$0xff]  ;;  %v222_v9 = vsel %vm220_vm0, %v166_v4, 0  ;;  %v84_v30 = vlaneseq }
  0x10   :  { %1535 = vmatprep.subr.bf16.mxu1 %v1777_v6  ;;  %v160_v8 = vld [vmem:[%s2255_s8 + $0x28] sm:$0xff]  ;;  %1529 = vmatprep.subr.bf16.mxu0 %v1777_v6  ;;  %v157_v11 = vld [vmem:[%s2255_s8 + $0x10] sm:$0xff]  ;;  %v158_v12 = vld [vmem:[%s2255_s8 + $0x18] sm:$0xff]  ;;  %v1778_v14 = vmov 2   ;;  %s2279_s5 = sld [smem:[#allocation9_spill]]  ;;  %vm1779_vm1 = vmmov 0  }
  0x11   :  { %1536 = vmatpush3.bf16.msra.mxu1 %v222_v9  ;;  %v165_v10 = vpack.c.bf16 %v160_v8, %v159_v7  ;;  %v164_v13 = vpack.c.bf16 %v158_v12, %v157_v11  ;;  %v167_v15 = vld [vmem:[%s2256_s9] sm:$0xff]  ;;  %v168_v16 = vld [vmem:[%s2256_s9 + $0x8] sm:$0xff]  ;;  %s2280_s23 = sld [smem:[#allocation10_spill]]  ;;  %1531 = vmatprep.mubr.msk.bf16.mxu0 %vm1779_vm1, %v1777_v6  ;;  %vm216_vm2 = vcmask 408576   ;;  %vm171_vm3 = vcmask 130048   ;;  %s1780_s26 = smov [#allocation2]  }
  0x12   :  { %95 = vperm.xlu1 %1708, %v73_v5   ;;  %81 = vperm.xlu0 %1707, %v73_v5   ;;  %v155_v17 = vld [vmem:[%s2255_s8] sm:$0xff]  ;;  %v170_v18 = vpack.c.bf16 %v168_v16, %v167_v15  ;;  %v156_v19 = vld [vmem:[%s2255_s8 + $0x8] sm:$0xff]  ;;  %s2281_s28 = sld [smem:[#allocation13_spill]]  ;;  %v85_v31 = vshrl.u32 %v84_v30, 7  ;;  %v278_v15 = vld [vmem:[%s2258_s11 + $0x10] sm:$0xff]  ;;  %vm333_vm4 = vcmask 392192  }
  0x13   :  { %1537 = vmatprep.subr.bf16.mxu1 %v1777_v6  ;;  %v163_v21 = vpack.c.bf16 %v156_v19, %v155_v17  ;;  %1543 = vmatprep.mubr.msk.bf16.mxu1 %vm1779_vm1, %v1777_v6  ;;  %v385_v25 = vld [vmem:[%s2261_s14] sm:$0xff]  ;;  %v386_v26 = vld [vmem:[%s2261_s14 + $0x8] sm:$0xff]  ;;  %v279_v16 = vld [vmem:[%s2258_s11 + $0x18] sm:$0xff]  ;;  %s2282_s29 = sld [smem:[#allocation11_spill]]  ;;  %vm453_vm5 = vcmask 523264   ;;  %vm518_vm6 = vcmask 1043456  }
  0x14   :  { %1530 = vmatpush3.bf16.msra.mxu0 %v170_v18  ;;  %v388_v27 = vpack.c.bf16 %v386_v26, %v385_v25  ;;  %v100_v32 = vsub.s32 1, %v85_v31  ;;  %v86_v33 = vsub.s32 0, %v85_v31  ;;  %v70_v34 = vld [vmem:[%s2253_s6] sm:$0x7]  ;;  %v116_v37 = vsub.s32 2, %v85_v31  ;;  %v287_v61 = vld [vmem:[%s2259_s12 + $0x8] sm:$0xff] }
  0x15   :  { %1538 = vmatpush3.bf16.msra.mxu1 %v165_v10  ;;  %1547 = vmatprep.subr.bf16.mxu0 %v1777_v6  ;;  %v1437_v53 = vld [vmem:[%s2254_s7] ss:$0 sm:$0xff]  ;;  %v281_v11 = vld [vmem:[%s2258_s11 + $0x28] sm:$0xff]  ;;  %v284_v17 = vpack.c.bf16 %v279_v16, %v278_v15  ;;  %s2283_s4 = sld [smem:[#allocation12_spill]]  ;;  %vm501_vm7 = vcmask 60416   ;;  %vm514_vm8 = vcmask 64512  }
  0x16   :  { %1710 = vset.pattern.permute.xlu1 %v1778_v14  ;;  %1709 = vset.pattern.permute.xlu0 %v1778_v14  ;;  %v132_v20 = vld [vmem:[%s2279_s5] sm:$0xff]  ;;  %v101_v38 = vrot.slane %v70_v34, %v100_v32  ;;  %v87_v39 = vrot.slane %v70_v34, %v86_v33  ;;  %v117_v42 = vrot.slane %v70_v34, %v116_v37  ;;  %v277_v19 = vld [vmem:[%s2258_s11 + $0x8] sm:$0xff]  ;;  %vm813_vm9 = vcmask 650240   ;;  %s1412_s27 = sshll.u32 %s1780_s26, 4  ;;  %s1413_s27 = int_to_ptr.vmem [resolvable:$true] %s1412_s27 }
  0x17   :  { %111 = vperm.xlu1 %1710, %v73_v5   ;;  %107 = vperm.xlu0 %1709, %v72_v0   ;;  %v153_v22 = vld [vmem:[%s2280_s23] sm:$0xff]  ;;  %v154_v23 = vld [vmem:[%s2280_s23 + $0x8] sm:$0xff]  ;;  %p1736_p1 = scmp.lt.s32.totalorder %s1413_s27, %s1413_s27 }
  0x18   :  { %1539 = vmatprep.subr.bf16.mxu1 %v1777_v6  ;;  %v162_v24 = vpack.c.bf16 %v154_v23, %v153_v22  ;;  %v1958_v28 = vld [vmem:[%s2281_s28] sm:$0xff] }
  0x19   :  { %1540 = vmatpush3.bf16.msra.mxu1 %v164_v13  ;;  %v387_v29 = vpack.c.bf16 %v1958_v28, %v1958_v28  ;;  %v286_v60 = vld [vmem:[%s2259_s12] sm:$0xff] }
  0x1a   :  { %1541 = vmatprep.subr.bf16.mxu1 %v1777_v6  ;;  %v280_v10 = vld [vmem:[%s2258_s11 + $0x20] sm:$0xff] }
  0x1b   :  { %1711 = vset.pattern.permute.xlu1 %v1776_v2  ;;  %1712 = vset.pattern.permute.xlu0 %v1775_v1  ;;  %v289_v2 = vpack.c.bf16 %v287_v61, %v286_v60  ;;  %v285_v13 = vpack.c.bf16 %v281_v11, %v280_v10  ;;  %v276_v18 = vld [vmem:[%s2258_s11] sm:$0xff] }
  0x1c   :  { %135 = vperm.xlu1 %1711, %v132_v20   ;;  %140 = vperm.xlu0 %1712, %v132_v20   ;;  %v1440_v33 = vld [vmem:[%s2257_s10] ss:$0 sm:$0xff] }
  0x1d   :  { %1542 = vmatpush3.bf16.msra.mxu1 %v163_v21  ;;  %v2011_v21 = vld [vmem:[%s2282_s29] sm:$0xff] }
  0x1e   :  { %1563 = vmatprep.subr.bf16.mxu1 %v1777_v6  ;;  %v282_v22 = vpack.c.bf16 %v2011_v21, %v2011_v21 }
  0x20   :  { %1713 = vset.pattern.permute.xlu1 %v1778_v14  ;;  %1544 = vmatmul.mubr.msk.bf16.vlgmr.msra.gmra.mxu1 %vm216_vm2, %v162_v24 }
  0x21   :  { %146 = vperm.xlu1 %1713, %v132_v20   ;;  %1565 = vmatprep.mubr.msk.bf16.mxu1 %vm1779_vm1, %v1777_v6  ;;  %v283_v20 = vpack.c.bf16 %v277_v19, %v276_v18 }
  0x22   :  { %1714 = vset.pattern.permute.xlu0 %v1778_v14  ;;  %1564 = vmatpush3.bf16.msra.mxu1 %v388_v27 }
  0x23   :  { %1575 = vmatprep.subr.bf16.mxu1 %v1777_v6 }
  0x28   :  { %1566 = vmatmul.mubr.msk.bf16.vlgmr.msra.gmra.mxu1 %vm171_vm3, %v387_v29 }
  0x29   :  { %1577 = vmatprep.mubr.msk.bf16.mxu1 %vm1779_vm1, %v1777_v6 }
  0x89   :  { %v92_v35 = vpop.permute.xlu1 %91  ;;  %v77_v36 = vpop.permute.xlu0 %76 }
  0x8a   :  { %v102_v43 = vmul.f32 %v101_v38, %v92_v35  ;;  %v88_v44 = vmul.f32 %v87_v39, %v77_v36 }
  0x8c   :  { %v104_v49 = vadd.f32 %v102_v43, %v88_v44 }
  0x8d   :  { %v96_v40 = vpop.permute.xlu1 %95  ;;  %v82_v41 = vpop.permute.xlu0 %81 }
  0x8e   :  { %v103_v45 = vmul.f32 %v101_v38, %v96_v40  ;;  %v89_v46 = vmul.f32 %v87_v39, %v82_v41 }
  0x90   :  { %v105_v50 = vadd.f32 %v103_v45, %v89_v46 }
  0x92   :  { %v112_v47 = vpop.permute.xlu1 %111  ;;  %v108_v48 = vpop.permute.xlu0 %107 }
  0x93   :  { %v119_v51 = vmul.f32 %v117_v42, %v112_v47  ;;  %v118_v52 = vmul.f32 %v117_v42, %v108_v48  ;;  %v439_v48 = vld [vmem:[%s2283_s4] sm:$0xff] }
  0x95   :  { %v121_v54 = vadd.f32 %v119_v51, %v105_v50  ;;  %v120_v55 = vadd.f32 %v118_v52, %v104_v49  ;;  %v1443_v50 = vld [vmem:[%s2260_s13] ss:$0 sm:$0xff]  ;;  %v562_v52 = vpack.c.bf16 %v439_v48, %v439_v48 }
  0x97   :  { %v129_v56 = vadd.f32 %v1437_v53, %v121_v54  ;;  %v128_v57 = vadd.f32 %v1437_v53, %v120_v55  ;;  %v136_v58 = vpop.permute.xlu1 %135  ;;  %v141_v59 = vpop.permute.xlu0 %140 }
  0x98   :  { %v138_v0 = vmul.f32 %v136_v58, %v87_v39  ;;  %v143_v1 = vmul.f32 %v141_v59, %v101_v38  ;;  %v567_v58 = vsel %vm171_vm3, %v562_v52, 0 }
  0x99   :  { %v131_v62 = vmax.f32 %v129_v56, 0.0  ;;  %v130_v63 = vmax.f32 %v128_v57, 0.0  ;;  %v1444_v56 = vld [vmem:[%s2262_s15] ss:$0 sm:$0xff] }
  0x9a   :  { %v144_v5 = vadd.f32 %v143_v1, %v138_v0 }
  0x9b   :  { %v169_v3 = vpack.c.bf16 %v131_v62, %v130_v63 }
  0x9c   :  { %v147_v4 = vpop.permute.xlu1 %146 }
  0x9d   :  { %v149_v7 = vmul.f32 %v147_v4, %v117_v42  ;;  %1532 = vmatmul.mubr.msk.bf16.vlgmr.msra.gmra.mxu0 %vm171_vm3, %v169_v3 }
  0x9e   :  { %1548 = vmatpush3.bf16.msra.mxu0 %v289_v2  ;;  %1549 = vmatprep.mubr.msk.bf16.mxu0 %vm1779_vm1, %v1777_v6 }
  0x9f   :  { %v150_v8 = vadd.f32 %v149_v7, %v144_v5  ;;  %1553 = vmatprep.subr.bf16.mxu0 %v1777_v6 }
  0xa1   :  { %v151_v9 = vadd.f32 %v1437_v53, %v150_v8 }
  0xa3   :  { %v1988_v12 = vmax.f32 %v151_v9, 0.0 }
  0xa5   :  { %v288_v14 = vpack.c.bf16 %v1988_v12, %v1988_v12 }
  0xa7   :  { %1550 = vmatmul.mubr.msk.bf16.vlgmr.msra.gmra.mxu0 %vm171_vm3, %v288_v14 }
  0xa8   :  { %1554 = vmatpush3.bf16.msra.mxu0 %v285_v13  ;;  %1559 = vmatprep.mubr.msk.bf16.mxu0 %vm1779_vm1, %v1777_v6 }
  0xa9   :  { %1555 = vmatprep.subr.bf16.mxu0 %v1777_v6 }
  0xac   :  { %1556 = vmatpush3.bf16.msra.mxu0 %v284_v17 }
  0xad   :  { %1557 = vmatprep.subr.bf16.mxu0 %v1777_v6 }
  0xb0   :  { %1558 = vmatpush3.bf16.msra.mxu0 %v283_v20 }
  0xb1   :  { %1569 = vmatprep.subr.bf16.mxu0 %v1777_v6 }
  0xb3   :  { %1560 = vmatmul.mubr.msk.bf16.vlgmr.msra.gmra.mxu0 %vm333_vm4, %v282_v22 }
  0xb4   :  { %1571 = vmatprep.mubr.msk.bf16.mxu0 %vm1779_vm1, %v1777_v6 }
  0xe0   :  { %v258_v23 = vpop.f32.mrf.mxu1 }
  0xe2   :  { %v1545_v24 = vpop.f32.mrf.mxu1 }
  0xe4   :  { %v261_v25 = vpop.f32.mrf.mxu1 }
  0xe6   :  { %v1546_v26 = vpop.f32.mrf.mxu1 }
  0xe8   :  { %v433_v27 = vpop.f32.mrf.mxu1 }
  0xe9   :  { %v434_v60 = vadd.f32 %v1444_v56, %v433_v27 }
  0xea   :  { %v1567_v29 = vpop.f32.mrf.mxu1 }
  0xeb   :  { %v2046_v61 = vpack.c.bf16 %v434_v60, %v434_v60  ;;  %v625_v29 = vsel %vm518_vm6, %v562_v52, 0 }
  0xec   :  { %v436_v30 = vpop.f32.mrf.mxu1 }
  0xee   :  { %v1568_v31 = vpop.f32.mrf.mxu1 }
 0x15d   :  { %v209_v32 = vpop.f32.mrf.mxu0 }
 0x15e   :  { %v259_v34 = vadd.f32 %v258_v23, %v209_v32 }
 0x15f   :  { %v1533_v35 = vpop.f32.mrf.mxu0 }
 0x160   :  { %v272_v36 = vadd.f32 %v1440_v33, %v259_v34  ;;  %v2070_v34 = vld [vmem:[%s2263_s16 + $0x30] sm:$0xff]  ;;  %v2079_v35 = vld [vmem:[%s2263_s16 + $0x28] sm:$0xff] }
 0x161   :  { %v212_v37 = vpop.f32.mrf.mxu0 }
 0x162   :  { %v452_v38 = vpack.c.bf16 %v272_v36, %v272_v36  ;;  %v262_v39 = vadd.f32 %v261_v25, %v212_v37  ;;  %v2086_v36 = vld [vmem:[%s2263_s16 + $0x20] sm:$0xff]  ;;  %v2093_v37 = vld [vmem:[%s2263_s16 + $0x18] sm:$0xff] }
 0x163   :  { %v1534_v40 = vpop.f32.mrf.mxu0 }
 0x164   :  { %v2023_v41 = vadd.f32 %v1440_v33, %v262_v39  ;;  %v458_v42 = vsel %vm453_vm5, %v452_v38, 0  ;;  %v519_v43 = vsel %vm518_vm6, %v452_v38, 0  ;;  %v2064_v33 = vld [vmem:[%s2263_s16 + $0x38] sm:$0xff]  ;;  %v2100_v38 = vld [vmem:[%s2263_s16 + $0x10] sm:$0xff]  ;;  %v2107_v39 = vld [vmem:[%s2263_s16 + $0x8] sm:$0xff] }
 0x165   :  { %1570 = vmatpush3.bf16.xpose.msra.mxu0 %v458_v42  ;;  %1576 = vmatpush3.bf16.msra.mxu1 %v519_v43  ;;  %v2114_v40 = vld [vmem:[%s2263_s16] sm:$0xff]  ;;  %v2123_v42 = vld [vmem:[%s2266_s19 + $0x8] sm:$0xff] }
 0x166   :  { %1581 = vmatprep.subr.bf16.mxu0 %v1777_v6  ;;  %1587 = vmatprep.subr.bf16.mxu1 %v1777_v6  ;;  %v2130_v43 = vld [vmem:[%s2266_s19] sm:$0xff] }
 0x167   :  { %v327_v44 = vpop.f32.mrf.mxu0 }
 0x169   :  { %v1551_v45 = vpop.f32.mrf.mxu0 }
 0x16b   :  { %v330_v46 = vpop.f32.mrf.mxu0 }
 0x16d   :  { %v1552_v47 = vpop.f32.mrf.mxu0 }
 0x173   :  { %v371_v49 = vpop.f32.mrf.mxu0 }
 0x174   :  { %v372_v51 = vadd.f32 %v371_v49, %v327_v44  ;;  %v815_v44 = vpack.c.bf16 %v2023_v41, %v2023_v41 }
 0x175   :  { %v1561_v53 = vpop.f32.mrf.mxu0 }
 0x176   :  { %v384_v54 = vadd.f32 %v1443_v50, %v372_v51  ;;  %v880_v46 = vsel %vm518_vm6, %v815_v44, 0  ;;  %v440_v51 = vld [vmem:[%s2283_s4 + $0x8] sm:$0xff]  ;;  %v822_v41 = vsel %vm453_vm5, %v815_v44, 0 }
 0x177   :  { %v374_v55 = vpop.f32.mrf.mxu0  ;;  %v922_v53 = vpack.c.bf16 %v440_v51, %v440_v51 }
 0x178   :  { %v2038_v57 = vpack.c.bf16 %v384_v54, %v384_v54 }
 0x179   :  { %v1562_v59 = vpop.f32.mrf.mxu0 }
 0x17a   :  { %1572 = vmatmul.mubr.msk.bf16.vlgmr.msra.gmra.mxu0 %vm453_vm5, %v2038_v57  ;;  %v817_v56 = vrot.slane %v2038_v57, 2  ;;  %v924_v59 = vrot.slane %v2046_v61, 2 }
 0x17b   :  { %1582 = vmatpush3.bf16.xpose.msra.mxu0 %v567_v58  ;;  %1583 = vmatprep.mubr.msk.bf16.mxu0 %vm1779_vm1, %v1777_v6  ;;  %v929_v58 = vsel %vm171_vm3, %v922_v53, 0 }
 0x17c   :  { %1593 = vmatprep.subr.mxu0 %v1777_v6 }
 0x182   :  { %1584 = vmatmul.mubr.msk.bf16.vlgmr.msra.gmra.mxu0 %vm171_vm3, %v2046_v61 }
 0x183   :  { %1597 = vmatprep.mubr.msk.f32.mxu0 %vm1779_vm1, %v1777_v6  ;;  %1594 = vmatpush3.msra.mxu0 %v2123_v42 }
 0x184   :  { %1595 = vmatprep.subr.mxu0 %v1777_v6 }
 0x185   :  { %1596 = vmatpush3.msra.mxu0 %v2130_v43 }
 0x186   :  { %1619 = vmatprep.subr.bf16.mxu0 %v1777_v6 }
 0x23a   :  { %v494_v62 = vpop.f32.mrf.mxu0 }
 0x23b   :  { %v500_v63 = vmul.f32 0.125, %v494_v62 }
 0x23c   :  { %v1573_v0 = vpop.f32.mrf.mxu0 }
 0x23d   :  { %v502_v1 = vsel %vm501_vm7, %v500_v63, -inf }
 0x23e   :  { %503 = vmax.xlane.f32.xlu1 %v502_v1  ;;  %v497_v2 = vpop.f32.mrf.mxu0 }
 0x240   :  { %v1574_v3 = vpop.f32.mrf.mxu0 }
 0x242   :  { %v603_v4 = vpop.f32.mrf.mxu0 }
 0x243   :  { %v609_v5 = vmul.f32 0.25, %v603_v4 }
 0x244   :  { %v1585_v7 = vpop.f32.mrf.mxu0 }
 0x245   :  { %v610_v8 = vsel %vm501_vm7, %v609_v5, -inf }
 0x246   :  { %611 = vmax.xlane.f32.xlu0 %v610_v8  ;;  %v606_v9 = vpop.f32.mrf.mxu0 }
 0x248   :  { %v1586_v10 = vpop.f32.mrf.mxu0 }
 0x2c7   :  { %v504_v11 = vpop.xlane.xlu1 %503 }
 0x2c8   :  { %v505_v13 = vsub.f32 %v500_v63, %v504_v11 }
 0x2ca   :  { %v506_v14 = vmul.f32 1.442695, %v505_v13 }
 0x2cc   :  { %1715 = vpow2.f32 %v506_v14 }
 0x2cf   :  { %v612_v15 = vpop.xlane.xlu0 %611 }
 0x2d0   :  { %v613_v16 = vsub.f32 %v609_v5, %v612_v15 }
 0x2d2   :  { %v614_v17 = vmul.f32 1.442695, %v613_v16 }
 0x2d4   :  { %1717 = vpow2.f32 %v614_v17 }
 0x2d9   :  { %v1716_v18 = vpop.eup %1715 }
 0x2da   :  { %v508_v19 = vsel %vm501_vm7, %v1716_v18, 0.0 }
 0x2db   :  { %509 = vadd.xlane.f32.xlu0 %v508_v19 }
 0x2e1   :  { %v1718_v20 = vpop.eup %1717 }
 0x2e2   :  { %v616_v22 = vsel %vm501_vm7, %v1718_v20, 0.0 }
 0x2e3   :  { %617 = vadd.xlane.f32.xlu1 %v616_v22 }
 0x364   :  { %v510_v23 = vpop.xlane.xlu0 %509 }
 0x365   :  { %1719 = vrcp.f32 %v510_v23 }
 0x36c   :  { %v618_v24 = vpop.xlane.xlu1 %617 }
 0x36d   :  { %1721 = vrcp.f32 %v618_v24 }
 0x372   :  { %v1720_v25 = vpop.eup %1719 }
 0x373   :  { %v512_v26 = vmul.f32 %v1720_v25, %v1716_v18 }
 0x375   :  { %v513_v27 = vpack.c.bf16 %v512_v26, %v512_v26 }
 0x377   :  { %1578 = vmatmul.mubr.msk.bf16.vlgmr.msra.gmra.mxu1 %vm514_vm8, %v513_v27 }
 0x378   :  { %1588 = vmatpush3.bf16.msra.mxu1 %v625_v29  ;;  %1589 = vmatprep.mubr.msk.bf16.mxu1 %vm1779_vm1, %v1777_v6 }
 0x379   :  { %1600 = vmatprep.subr.mxu1 %v1777_v6 }
 0x37a   :  { %v1722_v30 = vpop.eup %1721 }
 0x37b   :  { %v620_v31 = vmul.f32 %v1722_v30, %v1718_v20 }
 0x37d   :  { %v621_v32 = vpack.c.bf16 %v620_v31, %v620_v31  ;;  %v987_v31 = vsel %vm518_vm6, %v922_v53, 0 }
 0x37f   :  { %1590 = vmatmul.mubr.msk.bf16.vlgmr.msra.gmra.mxu1 %vm514_vm8, %v621_v32 }
 0x380   :  { %1601 = vmatpush3.msra.mxu1 %v2064_v33  ;;  %1616 = vmatprep.mubr.msk.f32.mxu1 %vm1779_vm1, %v1777_v6 }
 0x381   :  { %1602 = vmatprep.subr.mxu1 %v1777_v6 }
 0x382   :  { %1603 = vmatpush3.msra.mxu1 %v2070_v34 }
 0x383   :  { %1604 = vmatprep.subr.mxu1 %v1777_v6 }
 0x384   :  { %1605 = vmatpush3.msra.mxu1 %v2079_v35 }
 0x385   :  { %1606 = vmatprep.subr.mxu1 %v1777_v6 }
 0x386   :  { %1607 = vmatpush3.msra.mxu1 %v2086_v36 }
 0x387   :  { %1608 = vmatprep.subr.mxu1 %v1777_v6 }
 0x388   :  { %1609 = vmatpush3.msra.mxu1 %v2093_v37 }
 0x389   :  { %1610 = vmatprep.subr.mxu1 %v1777_v6 }
 0x38a   :  { %1611 = vmatpush3.msra.mxu1 %v2100_v38 }
 0x38b   :  { %1612 = vmatprep.subr.mxu1 %v1777_v6 }
 0x38c   :  { %1613 = vmatpush3.msra.mxu1 %v2107_v39 }
 0x38d   :  { %1614 = vmatprep.subr.mxu1 %v1777_v6 }
 0x38e   :  { %1615 = vmatpush3.msra.mxu1 %v2114_v40 }
 0x38f   :  { %1625 = vmatprep.subr.bf16.mxu1 %v1777_v6 }
 0x437   :  { %v555_v45 = vpop.f32.mrf.mxu1 }
 0x438   :  { %1617 = vmatmul.mubr.msk.f32.vlgmr.msra.gmra.mxu1 %vm453_vm5, %v555_v45 }
 0x439   :  { %1626 = vmatpush3.bf16.msra.mxu1 %v880_v46  ;;  %v1579_v47 = vpop.f32.mrf.mxu1  ;;  %1627 = vmatprep.mubr.msk.bf16.mxu1 %vm1779_vm1, %v1777_v6 }
 0x43a   :  { %1637 = vmatprep.subr.bf16.mxu1 %v1777_v6  ;;  %v1180_v47 = vld [vmem:[%s2265_s18 + $0x18] sm:$0xff] }
 0x43b   :  { %v558_v48 = vpop.f32.mrf.mxu1 }
 0x43c   :  { %v1178_v48 = vld [vmem:[%s2265_s18 + $0x8] sm:$0xff] }
 0x43d   :  { %v1580_v49 = vpop.f32.mrf.mxu1 }
 0x43e   :  { %v1177_v49 = vld [vmem:[%s2265_s18] sm:$0xff] }
 0x43f   :  { %v661_v50 = vpop.f32.mrf.mxu1 }
 0x440   :  { %1598 = vmatmul.mubr.msk.f32.vlgmr.msra.gmra.mxu0 %vm171_vm3, %v661_v50 }
 0x441   :  { %1620 = vmatpush3.bf16.xpose.msra.mxu0 %v822_v41  ;;  %v1591_v52 = vpop.f32.mrf.mxu1  ;;  %1621 = vmatprep.mubr.msk.bf16.mxu0 %vm1779_vm1, %v1777_v6 }
 0x442   :  { %1631 = vmatprep.subr.bf16.mxu0 %v1777_v6 }
 0x443   :  { %v664_v54 = vpop.f32.mrf.mxu1 }
 0x445   :  { %v1592_v55 = vpop.f32.mrf.mxu1 }
 0x448   :  { %1622 = vmatmul.mubr.msk.bf16.vlgmr.msra.gmra.mxu0 %vm453_vm5, %v817_v56 }
 0x449   :  { %1632 = vmatpush3.bf16.xpose.msra.mxu0 %v929_v58  ;;  %1633 = vmatprep.mubr.msk.bf16.mxu0 %vm1779_vm1, %v1777_v6 }
 0x44a   :  { %1643 = vmatprep.subr.mxu0 %v1777_v6 }
 0x450   :  { %1634 = vmatmul.mubr.msk.bf16.vlgmr.msra.gmra.mxu0 %vm171_vm3, %v924_v59 }
 0x451   :  { %1644 = vmatpush3.msra.mxu0 %v2123_v42  ;;  %1647 = vmatprep.mubr.msk.f32.mxu0 %vm1779_vm1, %v1777_v6 }
 0x452   :  { %1645 = vmatprep.subr.mxu0 %v1777_v6 }
 0x453   :  { %1646 = vmatpush3.msra.mxu0 %v2130_v43 }
 0x454   :  { %1669 = vmatprep.subr.mxu0 %v1777_v6 }
 0x4f8   :  { %v809_v57 = vpop.f32.mrf.mxu1 }
 0x4fa   :  { %v1618_v60 = vpop.f32.mrf.mxu1 }
 0x500   :  { %v736_v62 = vpop.f32.mrf.mxu0 }
 0x501   :  { %v810_v63 = vadd.f32 %v809_v57, %v736_v62 }
 0x502   :  { %v1599_v0 = vpop.f32.mrf.mxu0 }
 0x503   :  { %814 = vst.msk [vmem:[#allocation2] sm:$0xf] %vm813_vm9, %v810_v63 }
 0x508   :  { %v858_v61 = vpop.f32.mrf.mxu0 }
 0x509   :  { %v864_v1 = vmul.f32 0.125, %v858_v61 }
 0x50a   :  { %v1623_v2 = vpop.f32.mrf.mxu0 }
 0x50b   :  { %v865_v3 = vsel %vm501_vm7, %v864_v1, -inf }
 0x50c   :  { %866 = vmax.xlane.f32.xlu0 %v865_v3  ;;  %v861_v4 = vpop.f32.mrf.mxu0 }
 0x50e   :  { %v1624_v5 = vpop.f32.mrf.mxu0 }
 0x510   :  { %v965_v7 = vpop.f32.mrf.mxu0 }
 0x511   :  { %v971_v8 = vmul.f32 0.25, %v965_v7 }
 0x512   :  { %v1635_v9 = vpop.f32.mrf.mxu0 }
 0x513   :  { %v972_v10 = vsel %vm501_vm7, %v971_v8, -inf }
 0x514   :  { %973 = vmax.xlane.f32.xlu1 %v972_v10  ;;  %v968_v11 = vpop.f32.mrf.mxu0 }
 0x516   :  { %v1636_v13 = vpop.f32.mrf.mxu0 }
 0x595   :  { %v867_v14 = vpop.xlane.xlu0 %866 }
 0x596   :  { %v868_v15 = vsub.f32 %v864_v1, %v867_v14 }
 0x598   :  { %v869_v16 = vmul.f32 1.442695, %v868_v15 }
 0x59a   :  { %1723 = vpow2.f32 %v869_v16 }
 0x59d   :  { %v974_v17 = vpop.xlane.xlu1 %973 }
 0x59e   :  { %v975_v18 = vsub.f32 %v971_v8, %v974_v17 }
 0x5a0   :  { %v976_v19 = vmul.f32 1.442695, %v975_v18 }
 0x5a2   :  { %1725 = vpow2.f32 %v976_v19 }
 0x5a7   :  { %v1724_v20 = vpop.eup %1723 }
 0x5a8   :  { %v871_v22 = vsel %vm501_vm7, %v1724_v20, 0.0 }
 0x5a9   :  { %872 = vadd.xlane.f32.xlu0 %v871_v22 }
 0x5af   :  { %v1726_v23 = vpop.eup %1725 }
 0x5b0   :  { %v978_v24 = vsel %vm501_vm7, %v1726_v23, 0.0 }
 0x5b1   :  { %979 = vadd.xlane.f32.xlu1 %v978_v24 }
 0x632   :  { %v873_v25 = vpop.xlane.xlu0 %872 }
 0x633   :  { %1727 = vrcp.f32 %v873_v25 }
 0x63a   :  { %v980_v26 = vpop.xlane.xlu1 %979 }
 0x63b   :  { %1729 = vrcp.f32 %v980_v26 }
 0x640   :  { %v1728_v27 = vpop.eup %1727 }
 0x641   :  { %v875_v29 = vmul.f32 %v1728_v27, %v1724_v20 }
 0x643   :  { %v876_v30 = vpack.c.bf16 %v875_v29, %v875_v29 }
 0x645   :  { %1628 = vmatmul.mubr.msk.bf16.vlgmr.msra.gmra.mxu1 %vm514_vm8, %v876_v30 }
 0x646   :  { %1638 = vmatpush3.bf16.msra.mxu1 %v987_v31  ;;  %1639 = vmatprep.mubr.msk.bf16.mxu1 %vm1779_vm1, %v1777_v6 }
 0x647   :  { %1650 = vmatprep.subr.mxu1 %v1777_v6 }
 0x648   :  { %v1730_v32 = vpop.eup %1729 }
 0x649   :  { %v982_v44 = vmul.f32 %v1730_v32, %v1726_v23 }
 0x64b   :  { %v983_v45 = vpack.c.bf16 %v982_v44, %v982_v44 }
 0x64d   :  { %1640 = vmatmul.mubr.msk.bf16.vlgmr.msra.gmra.mxu1 %vm514_vm8, %v983_v45 }
 0x64e   :  { %1651 = vmatpush3.msra.mxu1 %v2064_v33  ;;  %1666 = vmatprep.mubr.msk.f32.mxu1 %vm1779_vm1, %v1777_v6 }
 0x64f   :  { %1652 = vmatprep.subr.mxu1 %v1777_v6 }
 0x650   :  { %1653 = vmatpush3.msra.mxu1 %v2070_v34 }
 0x651   :  { %1654 = vmatprep.subr.mxu1 %v1777_v6 }
 0x652   :  { %1655 = vmatpush3.msra.mxu1 %v2079_v35 }
 0x653   :  { %1656 = vmatprep.subr.mxu1 %v1777_v6 }
 0x654   :  { %1657 = vmatpush3.msra.mxu1 %v2086_v36 }
 0x655   :  { %1658 = vmatprep.subr.mxu1 %v1777_v6 }
 0x656   :  { %1659 = vmatpush3.msra.mxu1 %v2093_v37  ;;  %v1184_v37 = vld [vmem:[%s2264_s17 + $0x8] sm:$0xff] }
 0x657   :  { %1660 = vmatprep.subr.mxu1 %v1777_v6 }
 0x658   :  { %1661 = vmatpush3.msra.mxu1 %v2100_v38 }
 0x659   :  { %1662 = vmatprep.subr.mxu1 %v1777_v6 }
 0x65a   :  { %1663 = vmatpush3.msra.mxu1 %v2107_v39  ;;  %v1183_v39 = vld [vmem:[%s2264_s17] sm:$0xff] }
 0x65b   :  { %1664 = vmatprep.subr.mxu1 %v1777_v6 }
 0x65c   :  { %1665 = vmatpush3.msra.mxu1 %v2114_v40 }
 0x65d   :  { %1691 = vmatprep.subr.mxu1 %v1777_v6 }
 0x705   :  { %v916_v33 = vpop.f32.mrf.mxu1 }
 0x706   :  { %1667 = vmatmul.mubr.msk.f32.vlgmr.msra.gmra.mxu1 %vm453_vm5, %v916_v33 }
 0x707   :  { %v1629_v34 = vpop.f32.mrf.mxu1  ;;  %1692 = vmatpush3.msra.mxu1 %v2123_v42  ;;  %1695 = vmatprep.mubr.msk.f32.mxu1 %vm1779_vm1, %v1777_v6 }
 0x708   :  { %1693 = vmatprep.subr.mxu1 %v1777_v6 }
 0x709   :  { %v919_v35 = vpop.f32.mrf.mxu1  ;;  %1694 = vmatpush3.msra.mxu1 %v2130_v43  ;;  %v1181_v43 = vld [vmem:[%s2265_s18 + $0x20] sm:$0xff] }
 0x70a   :  { %1696 = vmatmul.mubr.msk.f32.vlgmr.msra.gmra.mxu1 %vm171_vm3, %v1958_v28  ;;  %v1182_v28 = vld [vmem:[%s2265_s18 + $0x28] sm:$0xff] }
 0x70b   :  { %v1630_v36 = vpop.f32.mrf.mxu1 }
 0x70d   :  { %v1023_v38 = vpop.f32.mrf.mxu1 }
 0x70e   :  { %1648 = vmatmul.mubr.msk.f32.vlgmr.msra.gmra.mxu0 %vm171_vm3, %v1023_v38 }
 0x70f   :  { %1670 = vmatpush3.msra.mxu0 %v1184_v37  ;;  %v1641_v40 = vpop.f32.mrf.mxu1  ;;  %1673 = vmatprep.mubr.msk.f32.mxu0 %vm1779_vm1, %v1777_v6 }
 0x710   :  { %1671 = vmatprep.subr.mxu0 %v1777_v6 }
 0x711   :  { %1672 = vmatpush3.msra.mxu0 %v1183_v39  ;;  %v1026_v42 = vpop.f32.mrf.mxu1 }
 0x712   :  { %1676 = vmatprep.subr.mxu0 %v1777_v6  ;;  %1674 = vmatmul.mubr.msk.f32.vlgmr.msra.gmra.mxu0 %vm171_vm3, %v1988_v12  ;;  %v1179_v12 = vld [vmem:[%s2265_s18 + $0x10] sm:$0xff]  ;;  %s1731_s18 = scalar_lea.vmem %s1413_s27, 128 }
 0x713   :  { %1677 = vmatpush3.msra.mxu0 %v1182_v28  ;;  %v1642_v46 = vpop.f32.mrf.mxu1  ;;  %1688 = vmatprep.mubr.msk.f32.mxu0 %vm1779_vm1, %v1777_v6  ;;  %p1732_p0 = scmp.ne.s32.totalorder %s1413_s27, %s1731_s18  ;;  %p1737_p2 = scmp.lt.s32.totalorder %s1731_s18, %s1731_s18 }
 0x714   :  { %1678 = vmatprep.subr.mxu0 %v1777_v6 }
 0x715   :  { %1679 = vmatpush3.msra.mxu0 %v1181_v43  ;;  %p1738_p3 = por %p1737_p2, %p1736_p1 }
 0x716   :  { %1680 = vmatprep.subr.mxu0 %v1777_v6 }
 0x717   :  { %1681 = vmatpush3.msra.mxu0 %v1180_v47  ;;  %p1739_p4 = pnand %p1738_p3, %p1732_p0 }
 0x718   :  { %1682 = vmatprep.subr.mxu0 %v1777_v6 }
 0x719   :  { %1683 = vmatpush3.msra.mxu0 %v1179_v12 }
 0x71a   :  { %1684 = vmatprep.subr.mxu0 %v1777_v6 }
 0x71b   :  { %1685 = vmatpush3.msra.mxu0 %v1178_v48 }
 0x71c   :  { %1686 = vmatprep.subr.mxu0 %v1777_v6 }
 0x71d   :  { %1687 = vmatpush3.msra.mxu0 %v1177_v49 }
 0x71e   :  { %1689 = vmatmul.mubr.msk.f32.vlgmr.msra.gmra.mxu0 %vm333_vm4, %v2011_v21 }
 0x7c6   :  { %v1171_v50 = vpop.f32.mrf.mxu1 }
 0x7c8   :  { %v1668_v51 = vpop.f32.mrf.mxu1 }
 0x7ca   :  { %v1400_v41 = vpop.f32.mrf.mxu1 }
 0x7cc   :  { %v1697_v52 = vpop.f32.mrf.mxu1 }
 0x7ce   :  { %v1098_v53 = vpop.f32.mrf.mxu0 }
 0x7cf   :  { %v1172_v54 = vadd.f32 %v1171_v50, %v1098_v53 }
 0x7d0   :  { %v1649_v55 = vpop.f32.mrf.mxu0 }
 0x7d1   :  { %1176 = vst.msk [vmem:[#allocation2 + $0x4] sm:$0xf] %vm813_vm9, %v1172_v54 }
 0x7d2   :  { %v1254_v56 = vpop.f32.mrf.mxu0 }
 0x7d3   :  { %1742 = shalt.err (!%p1739_p4)
}
 0x7d4   :  { %s1781_s3 = smov 64   ;;  %s1782_s28 = smov 4   ;;  %v1675_v6 = vpop.f32.mrf.mxu0  ;;  %vm1405_vm10 = vcmask 654336  }
 0x7d5   :  { %1418 = dma.vmem_to_hbm [thread:$0]  %s1413_s27, 128, %s2267_s20, [#allocation3], %s1781_s3, %s1781_s3, %s1782_s28  }
 0x7d6   :  { %s1783_s11 = smov [#allocation4]  }
 0x7d7   :  { %s1425_s0 = sshll.u32 %s1783_s11, 4  ;;  %s1426_s0 = int_to_ptr.vmem [resolvable:$true] %s1425_s0 }
 0x7d8   :  { %s1751_s10 = scalar_lea.vmem %s1426_s0, 128  ;;  %p1756_p6 = scmp.lt.s32.totalorder %s1426_s0, %s1426_s0 }
 0x7d9   :  { %p1752_p5 = scmp.ne.s32.totalorder %s1426_s0, %s1751_s10  ;;  %p1757_p7 = scmp.lt.s32.totalorder %s1751_s10, %s1751_s10 }
 0x7db   :  { %p1758_p8 = por %p1757_p7, %p1756_p6 }
 0x7dd   :  { %p1759_p9 = pnand %p1758_p8, %p1752_p5 }
 0x7de   :  { %v1327_v21 = vpop.f32.mrf.mxu0 }
 0x7df   :  { %v1328_v58 = vadd.f32 %v1327_v21, %v1254_v56 }
 0x7e0   :  { %v1690_v59 = vpop.f32.mrf.mxu0 }
 0x7e1   :  { %v1404_v57 = vadd.f32 %v1400_v41, %v1328_v58 }
 0x7e3   :  { %1406 = vst.msk [vmem:[#allocation4] sm:$0xff] %vm1405_vm10, %v1404_v57 }
 0x7e4   :  { %1762 = shalt.err (!%p1759_p9)
}
 0x7e5   :  { %1428 = dma.vmem_to_hbm [thread:$0]  %s1426_s0, 128, %s2268_s21, [#allocation5]  }
 0x7e6   :  { %1771 = dma.done.wait [#allocation3], 128  }
 0x7e7   :  { %1772 = vsyncadd [#allocation3], 4294967168 }
 0x7e8   :  { %1773 = dma.done.wait [#allocation5], 128  }
 0x7e9   :  { %1774 = vsyncadd [#allocation5], 4294967168 }
 0x7ea   :  { %1435 = vsyncpa [#allocation3], 1 }
 0x7eb   :  { %1436 = vsyncpa [#allocation5], 1 }

</bundles_post_ra>
